<compile_context>
chip_gen: v6e
topology: v6e:2x2x1
jax: 0.10.0
libtpu: 0.0.40
codegen_flags: <defaults>
</compile_context>

<pallas_src>
import jax
import jax.numpy as jnp
from jax.experimental import pallas as pl
from jax.experimental.pallas import tpu as pltpu


def mean_token_kernel(x_ref, n_ref, o_ref):
    # x_ref: (bt, T, D)   n_ref: (bt, 1) float32   o_ref: (bt, D)
    s = jnp.sum(x_ref[...].astype(jnp.float32), axis=1)      # token-sum -> (bt, D)
    o_ref[...] = (s / n_ref[...]).astype(o_ref.dtype)         # divide by n_tokens


def _batch_block(B):
    # Largest sublane-friendly block that divides B; tiny/odd batches use one block.
    for bt in (128, 64, 32, 16, 8):
        if B % bt == 0:
            return bt
    return B


def mean_token(x, n_tokens):
    """Pallas equivalent of MeanToken.forward(x, n_tokens)."""
    orig_lead = None
    if x.ndim == 3:
        B, T, D = x.shape
    elif x.ndim == 4:
        B0, B1, T, D = x.shape
        orig_lead = (B0, B1)
        x = x.reshape(B0 * B1, T, D)
        n_tokens = n_tokens.reshape(B0 * B1)
        B = B0 * B1
    else:
        # TODO(synk): PyTorch's ndim>4 fall-through relies on broadcasting that only
        # works for specific shapes; not implemented here.
        raise NotImplementedError("mean_token supports 3-D or 4-D inputs")

    n_f = n_tokens.astype(jnp.float32).reshape(B, 1)
    bt = _batch_block(B)
    grid = (B // bt,)

    out = pl.pallas_call(
        mean_token_kernel,
        out_shape=jax.ShapeDtypeStruct((B, D), jnp.float32),
        grid_spec=pltpu.PrefetchScalarGridSpec(
            num_scalar_prefetch=0,
            grid=grid,
            in_specs=[
                pl.BlockSpec((bt, T, D), lambda b: (b, 0, 0)),
                pl.BlockSpec((bt, 1), lambda b: (b, 0)),
            ],
            out_specs=pl.BlockSpec((bt, D), lambda b: (b, 0)),
        ),
        compiler_params=pltpu.CompilerParams(
            dimension_semantics=("parallel",)),  # batch blocks are independent
    )(x, n_f)

    if orig_lead is not None:
        out = out.reshape(orig_lead + (D,))
    return out


def reference(x, n_tokens):
    # Pure-JAX reference of MeanToken.forward for the sanity check.
    if x.ndim == 3:
        return x.sum(axis=1) / n_tokens.astype(jnp.float32)[:, None]
    return x.sum(axis=2) / n_tokens.astype(jnp.float32)[..., None]


if __name__ == "__main__":
    key = jax.random.PRNGKey(0)
    k1, k2, k3, k4 = jax.random.split(key, 4)

    # 3-D case: (batch, seq, hidden) -- hidden kept lane-dense (multiple of 128)
    B, T, D = 4, 16, 128
    x3 = jax.random.normal(k1, (B, T, D), jnp.float32)
    n3 = jax.random.randint(k2, (B,), 1, T + 1, jnp.int32)
    out3 = jax.block_until_ready(mean_token(x3, n3))
    ref3 = jax.block_until_ready(reference(x3, n3))
    assert out3.shape == (B, D)
    assert jnp.allclose(out3, ref3, atol=1e-5, rtol=1e-5)

    # 4-D case: (batch, heads, seq, hidden)
    B0, B1 = 2, 4
    x4 = jax.random.normal(k3, (B0, B1, T, D), jnp.float32)
    n4 = jax.random.randint(k4, (B0, B1), 1, T + 1, jnp.int32)
    out4 = jax.block_until_ready(mean_token(x4, n4))
    ref4 = jax.block_until_ready(reference(x4, n4))
    assert out4.shape == (B0, B1, D)
    assert jnp.allclose(out4, ref4, atol=1e-5, rtol=1e-5)

    print("KERNEL_OK")
</pallas_src>

<mosaic_0001>
module attributes {stable_mosaic.version = 11 : i64} {
  func.func @mean_token_kernel(%arg0: i32, %arg1: memref<4x16x128xf32, #tpu.memory_space<vmem>>, %arg2: memref<4x1xf32, #tpu.memory_space<vmem>>, %arg3: memref<4x128xf32, #tpu.memory_space<vmem>>) attributes {dimension_semantics = [#tpu.dimension_semantics<parallel>], iteration_bounds = array<i64: 1>, scalar_prefetch = 0 : i64, scratch_operands = 0 : i64, tpu.core_type = #tpu.core_type<tc>, window_params = [{transform_indices = @transform_0, window_bounds = array<i64: 4, 16, 128>}, {transform_indices = @transform_1, window_bounds = array<i64: 4, 1>}, {transform_indices = @transform_2, window_bounds = array<i64: 4, 128>}]} {
    %c0 = arith.constant 0 : index
    %c0_0 = arith.constant 0 : index
    %c0_1 = arith.constant 0 : index
    %0 = vector.load %arg1[%c0, %c0_0, %c0_1] : memref<4x16x128xf32, #tpu.memory_space<vmem>>, vector<4x16x128xf32>
    %cst = arith.constant dense<0.000000e+00> : vector<4x128xf32>
    %1 = vector.multi_reduction <add>, %0, %cst [1] : vector<4x16x128xf32> to vector<4x128xf32>
    %c0_2 = arith.constant 0 : index
    %c0_3 = arith.constant 0 : index
    %2 = vector.load %arg2[%c0_2, %c0_3] : memref<4x1xf32, #tpu.memory_space<vmem>>, vector<4x1xf32>
    %3 = vector.broadcast %2 : vector<4x1xf32> to vector<4x128xf32>
    %4 = arith.divf %1, %3 : vector<4x128xf32>
    %c0_4 = arith.constant 0 : index
    %c0_5 = arith.constant 0 : index
    %5 = vector.load %arg3[%c0_4, %c0_5] : memref<4x128xf32, #tpu.memory_space<vmem>>, vector<4x128xf32>
    tpu.vector_store %arg3[%c0_4, %c0_5], %4 {strides = array<i32>} : memref<4x128xf32, #tpu.memory_space<vmem>>, vector<4x128xf32>,
    return
  }
  func.func @transform_0(%arg0: i32) -> (i32, i32, i32) {
    %c0_i32 = arith.constant 0 : i32
    %c0_i32_0 = arith.constant 0 : i32
    %c0_i32_1 = arith.constant 0 : i32
    return %arg0, %c0_i32, %c0_i32_0 : i32, i32, i32
  }
  func.func @transform_1(%arg0: i32) -> (i32, i32) {
    %c0_i32 = arith.constant 0 : i32
    %c0_i32_0 = arith.constant 0 : i32
    return %arg0, %c0_i32 : i32, i32
  }
  func.func @transform_2(%arg0: i32) -> (i32, i32) {
    %c0_i32 = arith.constant 0 : i32
    %c0_i32_0 = arith.constant 0 : i32
    return %arg0, %c0_i32 : i32, i32
  }
}

</mosaic_0001>

<bundles_post_ra>
// kernel: tpu_custom_call.1
= control target key start
LH: loop header
LB: loop body
LE: loop exit
PB: predicated region body
PF: predicated region fallthrough
CT: control target
= control target key end

     0   :  { %7 = vsyncpa [#allocation3], 0  ;;  %s199_s0 = inlined_call_operand.hbm [shape: f32[4,16,128], index: 0, kind: input, shape index: {}]   ;;  %s200_s1 = inlined_call_operand.vmem [shape: f32[4,1], index: 1, kind: input, shape index: {}]   ;;  %s201_s2 = inlined_call_operand.hbm [shape: f32[4,128], index: 2, kind: output, shape index: {}]  }
   0x1   :  { %8 = vsyncpa [#allocation4], 0  ;;  %s170_s9 = smov [#allocation2]  }
   0x2   :  { %s14_s10 = sshll.u32 %s170_s9, 4  ;;  %s15_s10 = int_to_ptr.vmem [resolvable:$true] %s14_s10 }
   0x3   :  { %s134_s11 = scalar_lea.vmem %s15_s10, 1024  ;;  %p139_p1 = scmp.lt.s32.totalorder %s15_s10, %s15_s10 }
   0x4   :  { %p135_p0 = scmp.ne.s32.totalorder %s15_s10, %s134_s11  ;;  %p140_p2 = scmp.lt.s32.totalorder %s134_s11, %s134_s11 }
   0x6   :  { %p141_p3 = por %p140_p2, %p139_p1 }
   0x8   :  { %p142_p4 = pnand %p141_p3, %p135_p0 }
   0xa   :  { %145 = shalt.err (!%p142_p4)
}
   0xb   :  { %s171_s12 = smov 128   ;;  %s172_s13 = smov 8  }
   0xc   :  { %20 = dma.hbm_to_vmem [thread:$0]  %s199_s0, 1024, %s15_s10, [#allocation3], %s171_s12, %s171_s12, %s172_s13  }
   0xd   :  { %166 = dma.done.wait [#allocation3], 1024  }
   0xe   :  { %167 = vsyncadd [#allocation3], 4294966272  ;;  %v173_v0 = vmov 0   ;;  %v62_v1 = vld [vmem:[%s200_s1] sm:$0xf]  ;;  %v28_v2 = vld [vmem:[#allocation2 + $0x10] sm:$0xff] }
   0xf   :  { %117 = vset.pattern.permute.xlu0 %v173_v0  ;;  %v29_v3 = vld [vmem:[#allocation2 + $0x18] sm:$0xff]  ;;  %v26_v4 = vld [vmem:[#allocation2] sm:$0xff]  ;;  %v31_v6 = vld [vmem:[#allocation2 + $0x28] sm:$0xff]  ;;  %vm87_vm0 = vcmask 1041409   ;;  %vm90_vm1 = vcmask 1042434   ;;  %s174_s0 = smov [#allocation5]  }
  0x10   :  { %65 = vperm.xlu0 %117, %v62_v1   ;;  %v30_v5 = vld [vmem:[#allocation2 + $0x20] sm:$0xff]  ;;  %v27_v7 = vld [vmem:[#allocation2 + $0x8] sm:$0xff]  ;;  %v32_v8 = vld [vmem:[#allocation2 + $0x30] sm:$0xff]  ;;  %v41_v10 = vadd.f32 %v29_v3, %v28_v2  ;;  %s103_s1 = sshll.u32 %s174_s0, 4  ;;  %vm93_vm2 = vcmask 1043459   ;;  %s104_s1 = int_to_ptr.vmem [resolvable:$true] %s103_s1 }
  0x11   :  { %v33_v9 = vld [vmem:[#allocation2 + $0x38] sm:$0xff]  ;;  %v48_v11 = vadd.f32 %v31_v6, %v30_v5  ;;  %v34_v12 = vadd.f32 %v27_v7, %v26_v4  ;;  %s146_s18 = scalar_lea.vmem %s104_s1, 64  ;;  %p151_p6 = scmp.lt.s32.totalorder %s104_s1, %s104_s1 }
  0x12   :  { %v55_v13 = vadd.f32 %v33_v9, %v32_v8  ;;  %v42_v14 = vrot.slane %v41_v10, 4  ;;  %p147_p5 = scmp.ne.s32.totalorder %s104_s1, %s146_s18  ;;  %p152_p7 = scmp.lt.s32.totalorder %s146_s18, %s146_s18 }
  0x13   :  { %v49_v15 = vrot.slane %v48_v11, 4  ;;  %v35_v16 = vrot.slane %v34_v12, 4 }
  0x14   :  { %v56_v17 = vrot.slane %v55_v13, 4  ;;  %v43_v18 = vadd.f32 %v42_v14, %v41_v10  ;;  %p153_p8 = por %p152_p7, %p151_p6 }
  0x15   :  { %v50_v19 = vadd.f32 %v49_v15, %v48_v11  ;;  %v36_v20 = vadd.f32 %v35_v16, %v34_v12 }
  0x16   :  { %v57_v21 = vadd.f32 %v56_v17, %v55_v13  ;;  %v44_v26 = vrot.slane %v43_v18, 2  ;;  %p154_p9 = pnand %p153_p8, %p147_p5 }
  0x17   :  { %v51_v27 = vrot.slane %v50_v19, 2  ;;  %v37_v28 = vrot.slane %v36_v20, 2 }
  0x18   :  { %v58_v29 = vrot.slane %v57_v21, 2  ;;  %v45_v30 = vadd.f32 %v44_v26, %v43_v18 }
  0x19   :  { %v52_v31 = vadd.f32 %v51_v27, %v50_v19  ;;  %v38_v32 = vadd.f32 %v37_v28, %v36_v20 }
  0x1a   :  { %v59_v33 = vadd.f32 %v58_v29, %v57_v21  ;;  %v46_v34 = vrot.slane %v45_v30, 1 }
  0x1b   :  { %v53_v35 = vrot.slane %v52_v31, 1  ;;  %v39_v36 = vrot.slane %v38_v32, 1 }
  0x1c   :  { %v60_v37 = vrot.slane %v59_v33, 1  ;;  %v47_v38 = vadd.f32 %v46_v34, %v45_v30 }
  0x1d   :  { %v54_v39 = vadd.f32 %v53_v35, %v52_v31  ;;  %v40_v41 = vadd.f32 %v39_v36, %v38_v32 }
  0x1e   :  { %v61_v42 = vadd.f32 %v60_v37, %v59_v33 }
  0x8b   :  { %v66_v22 = vpop.permute.xlu0 %65 }
  0x8c   :  { %v67_v23 = vrot.slane %v66_v22, 1  ;;  %v68_v24 = vrot.slane %v66_v22, 2  ;;  %v69_v25 = vrot.slane %v66_v22, 3  ;;  %118 = vrcp.f32 %v66_v22 }
  0x8e   :  { %120 = vrcp.f32 %v67_v23 }
  0x8f   :  { %122 = vrcp.f32 %v68_v24 }
  0x90   :  { %124 = vrcp.f32 %v69_v25 }
  0x99   :  { %v119_v40 = vpop.eup %118 }
  0x9a   :  { %v75_v48 = vmul.f32 %v119_v40, %v40_v41 }
  0x9b   :  { %v121_v43 = vpop.eup %120 }
  0x9c   :  { %v123_v44 = vpop.eup %122  ;;  %v77_v45 = vmul.f32 %v121_v43, %v47_v38 }
  0x9d   :  { %v125_v46 = vpop.eup %124  ;;  %v79_v47 = vmul.f32 %v123_v44, %v54_v39 }
  0x9e   :  { %v81_v49 = vmul.f32 %v125_v46, %v61_v42  ;;  %v86_v50 = vrot.slane %v77_v45, 7 }
  0x9f   :  { %v89_v51 = vrot.slane %v79_v47, 6 }
  0xa0   :  { %v88_v52 = vsel %vm87_vm0, %v86_v50, %v75_v48  ;;  %v92_v53 = vrot.slane %v81_v49, 5 }
  0xa1   :  { %v91_v54 = vsel %vm90_vm1, %v89_v51, %v88_v52 }
  0xa2   :  { %v94_v55 = vsel %vm93_vm2, %v92_v53, %v91_v54 }
  0xa3   :  { %96 = vst [vmem:[#allocation5] sm:$0xf] %v94_v55 }
  0xa4   :  { %157 = shalt.err (!%p154_p9)
}
  0xa5   :  { %106 = dma.vmem_to_hbm [thread:$0]  %s104_s1, 64, %s201_s2, [#allocation4]  }
  0xa6   :  { %168 = dma.done.wait [#allocation4], 64  }
  0xa7   :  { %169 = vsyncadd [#allocation4], 4294967232 }
  0xa8   :  { %110 = vsyncpa [#allocation3], 1 }
  0xa9   :  { %111 = vsyncpa [#allocation4], 1 }

</bundles_post_ra>
